<compile_context>
chip_gen: v7x
topology: tpu7x:2x2x1
jax: 0.10.0
libtpu: 0.0.40
codegen_flags: <defaults>
</compile_context>

<pallas_src>
import jax
import jax.numpy as jnp
from jax.experimental import pallas as pl
from jax.experimental.pallas import tpu as pltpu

LANE = 128


# ---------------------------------------------------------------------------
# Kernel: identity copy of one tile.
# ---------------------------------------------------------------------------
def _copy_kernel(x_ref, o_ref):
    o_ref[...] = x_ref[...]


# ---------------------------------------------------------------------------
# Helpers.
# ---------------------------------------------------------------------------
def _resolve_shape(total, shape):
    """Resolve a possible single -1 entry, torch.view-style."""
    if len(shape) == 1 and isinstance(shape[0], (tuple, list)):
        shape = tuple(shape[0])
    shape = list(shape)
    if shape.count(-1) > 1:
        raise ValueError("only one -1 allowed in target shape")
    if -1 in shape:
        known = 1
        for s in shape:
            if s != -1:
                known *= s
        if known == 0 or total % known != 0:
            raise ValueError("cannot infer -1 dimension")
        shape[shape.index(-1)] = total // known
    prod = 1
    for s in shape:
        prod *= s
    if prod != total:
        raise ValueError("target shape incompatible with input size")
    return tuple(shape)


def _vmem_capacity_bytes():
    """Best-effort query of this generation's VMEM size (v7x=64MiB, v5e/v6e=128MiB)."""
    try:
        info = pltpu.get_tpu_info()
        cap = getattr(info, "vmem_capacity_bytes", None)
        if cap:
            return int(cap)
    except Exception:
        pass
    return 64 * 1024 * 1024  # conservative default (v7x)


def _small_full_copy(x):
    """Single full-block copy for small tensors whose size is not 128-divisible."""
    flat = x.reshape(1, x.size)  # full-extent block dims are always legal
    return pl.pallas_call(
        _copy_kernel,
        out_shape=jax.ShapeDtypeStruct(flat.shape, flat.dtype),
        cost_estimate=pl.CostEstimate(
            flops=0, transcendentals=0,
            bytes_accessed=2 * x.size * jnp.dtype(x.dtype).itemsize),
    )(flat)


def _materialized_copy(x):
    """Stream x through a Pallas identity copy: exactly one HBM read + write."""
    total = x.size
    dt = jnp.dtype(x.dtype)
    itemsize = dt.itemsize
    name = dt.name

    if total == 0:
        return x
    if any(t in name for t in ("int4", "uint4", "float4", "e2m1")):
        # TODO(synk): sub-byte packed dtypes need deeper native sublane tiling;
        # fall back to the metadata-only view for them.
        return x

    total_bytes = total * itemsize
    vmem_cap = _vmem_capacity_bytes()

    if total % LANE != 0:
        # Cannot form a lane-dense slab without padding.  For small tensors do a
        # single full-block copy; for large odd-sized tensors keep the view.
        if 4 * total_bytes <= min(16 * 1024 * 1024, vmem_cap // 2):
            return _small_full_copy(x)
        # TODO(synk): large non-128-divisible tensors are returned as a view
        # (no fresh buffer); a padded/strided copy path could be added.
        return x

    # ---- Lane-dense slab (rows, C), C a large multiple of 128 -------------
    rows0 = total // LANE
    k = 1
    for cand in (16, 8, 4, 2):          # C up to 2048
        if rows0 % cand == 0:
            k = cand
            break
    C = LANE * k
    rows = rows0 // k
    slab = x.reshape(rows, C)           # metadata-only for contiguous inputs

    # dtype-aware sublane alignment: f32 -> 8, bf16 -> 16, int8/fp8 -> 32.
    sub = max(8, 32 // itemsize)

    # ---- Generation-aware block size ---------------------------------------
    # ~8 MiB blocks amortize the ~0.35us per-grid-step bubble to a few percent
    # even at v7x's 3.2 TB/s HBM; double-buffered in+out footprint = 4x block
    # (~32 MiB) stays well under every generation's VMEM (64 MiB on v7x).
    target_block_bytes = min(8 << 20, max(1 << 20, vmem_cap // 8))
    br = max(sub, (target_block_bytes // (C * itemsize)) // sub * sub)

    # Guarantee enough grid steps on large tensors so both v7x TensorCores
    # stream and the 2-deep pipeline has work to overlap.
    if total_bytes >= (4 << 20):
        min_steps = 4
    elif total_bytes >= (1 << 20):
        min_steps = 2
    else:
        min_steps = 1
    if min_steps > 1:
        cap = (rows // min_steps) // sub * sub
        if cap >= sub:
            br = min(br, cap)

    if br >= rows:
        br = rows                       # tiny tensor: one full block (always legal)
    elif rows % br != 0:
        # Prefer a tail-free block: largest multiple of `sub` in [br/2, br]
        # dividing rows, so every store is an unmasked vst.
        b = (br // sub) * sub
        lo = max(sub, br // 2)
        while b >= lo:
            if rows % b == 0:
                br = b
                break
            b -= sub

    grid = (pl.cdiv(rows, br),)         # ragged tail (if any) is masked by Pallas

    block_bytes = br * C * itemsize
    # No artificial 48 MiB cap: scale with the chip.  v7x -> <=48 MiB,
    # v5e/v6e -> up to ~96 MiB.  Footprint (4x block) always fits.
    vmem_limit = int(min(max(8 * block_bytes, 32 << 20), (vmem_cap * 3) // 4))

    return pl.pallas_call(
        _copy_kernel,
        out_shape=jax.ShapeDtypeStruct((rows, C), x.dtype),
        grid_spec=pltpu.PrefetchScalarGridSpec(
            num_scalar_prefetch=0,
            grid=grid,
            in_specs=[pl.BlockSpec((br, C), lambda i: (i, 0))],
            out_specs=pl.BlockSpec((br, C), lambda i: (i, 0)),
        ),
        compiler_params=pltpu.CompilerParams(
            dimension_semantics=("parallel",),   # shards grid steps across TCs
            vmem_limit_bytes=vmem_limit,
        ),
        cost_estimate=pl.CostEstimate(
            flops=0, transcendentals=0, bytes_accessed=2 * total_bytes),
    )(slab)


def pallas_reshape(x, *shape, materialize=False):
    """Equivalent of torch.Tensor.view(*shape).

    Default: metadata-only reshape (no data movement, matches torch.view).
    materialize=True: additionally force a single-pass Pallas copy of the data.
    """
    total = x.size
    out_shape = _resolve_shape(total, shape)
    if not materialize:
        # Fast path: a view needs zero HBM traffic.
        return jnp.reshape(x, out_shape)
    return jnp.reshape(_materialized_copy(x), out_shape)


# ---------------------------------------------------------------------------
# Module-style wrapper mirroring the PyTorch class.
# ---------------------------------------------------------------------------
class Reshape:
    def __init__(self, *shape, materialize=False):
        self.shape = shape
        self.materialize = materialize

    def __call__(self, inp):
        return pallas_reshape(inp, *self.shape, materialize=self.materialize)


if __name__ == "__main__":
    key = jax.random.PRNGKey(0)
    # Small NCHW input: batch=2, channels=4, spatial=16x16.
    x = jax.random.normal(key, (2, 4, 16, 16), dtype=jnp.float32)

    # Default fast path: metadata-only, identical to inp.view(2, -1).
    mod = Reshape(2, -1)
    y = jax.block_until_ready(mod(x))
    ref = x.reshape(2, -1)
    assert y.shape == ref.shape, (y.shape, ref.shape)
    assert y.dtype == ref.dtype
    assert bool(jnp.array_equal(y, ref))

    # Materialized path exercises the Pallas copy kernel once (f32).
    y_mat = jax.block_until_ready(pallas_reshape(x, -1, 4, 256, materialize=True))
    assert y_mat.shape == (2, 4, 256)
    assert bool(jnp.array_equal(y_mat, x.reshape(-1, 4, 256)))

    # Materialized path with bf16 to exercise dtype-aware sublane alignment.
    xb = x.astype(jnp.bfloat16)
    y_b = jax.block_until_ready(pallas_reshape(xb, 8, -1, materialize=True))
    assert y_b.shape == (8, 256)
    assert bool(jnp.array_equal(y_b, xb.reshape(8, -1)))

    # Materialized path for a small tensor whose size is NOT 128-divisible:
    # exercises the single full-block fallback copy instead of a silent no-op.
    x_odd = jax.random.normal(jax.random.PRNGKey(1), (3, 5, 7), dtype=jnp.float32)
    y_odd = jax.block_until_ready(pallas_reshape(x_odd, -1, 35, materialize=True))
    assert y_odd.shape == (3, 35)
    assert bool(jnp.array_equal(y_odd, x_odd.reshape(-1, 35)))

    print("KERNEL_OK")
</pallas_src>

<mosaic_0001>
module attributes {stable_mosaic.version = 11 : i64} {
  func.func @_copy_kernel(%arg0: i32, %arg1: memref<1x2048xf32, #tpu.memory_space<vmem>>, %arg2: memref<1x2048xf32, #tpu.memory_space<vmem>>) attributes {dimension_semantics = [#tpu.dimension_semantics<parallel>], iteration_bounds = array<i64: 1>, scalar_prefetch = 0 : i64, scratch_operands = 0 : i64, tpu.core_type = #tpu.core_type<tc>, window_params = [{transform_indices = @transform_0, window_bounds = array<i64: 1, 2048>}, {transform_indices = @transform_1, window_bounds = array<i64: 1, 2048>}]} {
    %c0 = arith.constant 0 : index
    %c0_0 = arith.constant 0 : index
    %0 = vector.load %arg1[%c0, %c0_0] : memref<1x2048xf32, #tpu.memory_space<vmem>>, vector<1x2048xf32>
    %c0_1 = arith.constant 0 : index
    %c0_2 = arith.constant 0 : index
    %1 = vector.load %arg2[%c0_1, %c0_2] : memref<1x2048xf32, #tpu.memory_space<vmem>>, vector<1x2048xf32>
    tpu.vector_store %arg2[%c0_1, %c0_2], %0 {strides = array<i32>} : memref<1x2048xf32, #tpu.memory_space<vmem>>, vector<1x2048xf32>,
    return
  }
  func.func @transform_0(%arg0: i32) -> (i32, i32) {
    %c0_i32 = arith.constant 0 : i32
    %c0_i32_0 = arith.constant 0 : i32
    return %arg0, %c0_i32 : i32, i32
  }
  func.func @transform_1(%arg0: i32) -> (i32, i32) {
    %c0_i32 = arith.constant 0 : i32
    %c0_i32_0 = arith.constant 0 : i32
    return %arg0, %c0_i32 : i32, i32
  }
}

</mosaic_0001>

<bundles_post_ra>
// kernel: tpu_custom_call.1
= control target key start
LH: loop header
LB: loop body
LE: loop exit
PB: predicated region body
PF: predicated region fallthrough
CT: control target
= control target key end

     0   :  { %6 = vsyncpa [#allocation3], 0  ;;  %s126_s0 = inlined_call_operand.hbm [shape: f32[1,2048], index: 0, kind: input, shape index: {}]   ;;  %s127_s1 = inlined_call_operand.hbm [shape: f32[1,2048], index: 1, kind: output, shape index: {}]  }
   0x1   :  { %7 = vsyncpa [#allocation4], 0  ;;  %s90_s6 = smov [#allocation2]   ;;  %s42_s10 = scalar_lea.hbm %s126_s0, 256 }
   0x2   :  { %s14_s7 = sshll.u32 %s90_s6, 4  ;;  %p43_p0 = scmp.ne.s32.totalorder %s126_s0, %s42_s10  ;;  %s15_s7 = int_to_ptr.vmem [resolvable:$true] %s14_s7 }
   0x3   :  { %p46_p1 = scmp.lt.u32.totalorder %s42_s10, %s126_s0 }
   0x5   :  { %p48_p2 = pnand %p46_p1, %p43_p0 }
   0x7   :  { %51 = shalt.err (!%p48_p2)
}
   0x8   :  { %s52_s15 = scalar_lea.vmem %s15_s7, 256  ;;  %p57_p4 = scmp.lt.s32.totalorder %s15_s7, %s15_s7 }
   0x9   :  { %p53_p3 = scmp.ne.s32.totalorder %s15_s7, %s52_s15  ;;  %p58_p5 = scmp.lt.s32.totalorder %s52_s15, %s52_s15 }
   0xb   :  { %p59_p6 = por %p58_p5, %p57_p4 }
   0xd   :  { %p60_p7 = pnand %p59_p6, %p53_p3 }
   0xf   :  { %63 = shalt.err (!%p60_p7)
}
  0x10   :  { %17 = dma.hbm_to_vmem [thread:$0]  %s126_s0, 256, %s15_s7, [#allocation3]  }
  0x11   :  { %86 = dma.done.wait [#allocation3], 256  }
  0x12   :  { %87 = vsyncadd [#allocation3], 4294967040  ;;  %s91_s18 = smov [#allocation5]   ;;  %v21_v0 = vld [vmem:[#allocation2] sm:$0xff]  ;;  %v22_v1 = vld [vmem:[#allocation2 + $0x8] sm:$0xff] }
  0x13   :  { %s31_s19 = sshll.u32 %s91_s18, 4  ;;  %23 = vst [vmem:[#allocation5] sm:$0xff] %v21_v0  ;;  %24 = vst [vmem:[#allocation5 + $0x8] sm:$0xff] %v22_v1  ;;  %s32_s19 = int_to_ptr.vmem [resolvable:$true] %s31_s19 }
  0x14   :  { %s64_s20 = scalar_lea.vmem %s32_s19, 256  ;;  %p69_p9 = scmp.lt.s32.totalorder %s32_s19, %s32_s19 }
  0x15   :  { %p65_p8 = scmp.ne.s32.totalorder %s32_s19, %s64_s20  ;;  %p70_p10 = scmp.lt.s32.totalorder %s64_s20, %s64_s20 }
  0x17   :  { %p71_p11 = por %p70_p10, %p69_p9 }
  0x19   :  { %p72_p12 = pnand %p71_p11, %p65_p8 }
  0x1b   :  { %75 = shalt.err (!%p72_p12)
}
  0x1c   :  { %s76_s0 = scalar_lea.hbm %s127_s1, 256 }
  0x1d   :  { %p77_p13 = scmp.ne.s32.totalorder %s127_s1, %s76_s0  ;;  %p80_p0 = scmp.lt.u32.totalorder %s76_s0, %s127_s1 }
  0x1f   :  { %p82_p1 = pnand %p80_p0, %p77_p13 }
  0x21   :  { %85 = shalt.err (!%p82_p1)
}
  0x22   :  { %34 = dma.vmem_to_hbm [thread:$0]  %s32_s19, 256, %s127_s1, [#allocation4]  }
  0x23   :  { %88 = dma.done.wait [#allocation4], 256  }
  0x24   :  { %89 = vsyncadd [#allocation4], 4294967040 }
  0x25   :  { %38 = vsyncpa [#allocation3], 1 }
  0x26   :  { %39 = vsyncpa [#allocation4], 1 }

</bundles_post_ra>
